<compile_context>
chip_gen: v6e
topology: v6e:2x2x1
jax: 0.10.0
libtpu: 0.0.40
codegen_flags: <defaults>
</compile_context>

<pallas_src>
import functools
from typing import NamedTuple

import jax
import jax.numpy as jnp
from jax.experimental import pallas as pl
from jax.experimental.pallas import tpu as pltpu


class Dims(NamedTuple):
    d: int        # input/reconstruction dim
    latent: int   # latent_dim
    hidden: int   # hidden_dim
    dp: int       # d padded to 128
    lp: int       # latent padded to 128
    hp: int       # hidden padded to 128


def ltae_kernel(x_ref, eps_ref,
                ew1_ref, eb1_ref, ew2_ref, eb2_ref, ew3_ref, eb3_ref,
                hw_ref, hb_ref,
                dw1_ref, db1_ref, dw2_ref, db2_ref, dw3_ref, db3_ref,
                recon_ref, mu_ref, expsc_ref,
                xpad_ref, epad_ref, *, d, hdim, hp):
    # Lane-pad the narrow (tb, d)/(tb, hdim) input blocks into 128-wide VMEM
    # scratch so every matmul runs with full-K lane-dense operands on the MXU.
    # Padded lanes are exact zeros, so with zero-padded weights/biases the live
    # region is bit-identical and exp() only ever sees 0 in padded lanes.
    xpad_ref[...] = jnp.zeros(xpad_ref.shape, jnp.float32)
    xpad_ref[:, :d] = x_ref[...].astype(jnp.float32)
    epad_ref[...] = jnp.zeros(epad_ref.shape, jnp.float32)
    epad_ref[:, :hdim] = eps_ref[...].astype(jnp.float32)

    def lin(v, w_ref, b_ref):
        w = w_ref[...]
        # Matmul in the weight dtype (f32 for the head, bf16 for enc/dec by
        # default) with f32 accumulation; bias add and all downstream
        # elementwise math stay f32.
        return (jnp.dot(v.astype(w.dtype), w, preferred_element_type=jnp.float32)
                + b_ref[...])

    # Encoder: Linear -> ReLU -> Linear -> ReLU -> Linear
    h1 = jnp.maximum(lin(xpad_ref[...], ew1_ref, eb1_ref), 0.0)
    h2 = jnp.maximum(lin(h1, ew2_ref, eb2_ref), 0.0)
    latent = lin(h2, ew3_ref, eb3_ref)

    # Fused MVNormalNetwork heads: [mu | sc] in one N=2*hp matmul (fills the
    # 256-wide MXU on v6e/v7x), then split / exp.
    head = lin(latent, hw_ref, hb_ref)          # (tb, 2*hp)
    mu = head[:, :hp]
    exp_sc = jnp.exp(head[:, hp:])

    # reparameterize: squeeze(diag_embed(exp_sc) @ eps[..., None]) + mu
    # == exp_sc * eps + mu exactly (diagonal scale).
    z = exp_sc * epad_ref[...] + mu

    # Decoder: Linear -> ReLU -> Linear -> ReLU -> Linear
    g = jnp.maximum(lin(z, dw1_ref, db1_ref), 0.0)
    g = jnp.maximum(lin(g, dw2_ref, db2_ref), 0.0)
    recon = lin(g, dw3_ref, db3_ref)

    # Store only the live lanes: narrow output blocks are contiguous in HBM,
    # cutting output traffic ~32x vs 128-lane-padded outputs.
    recon_ref[...] = recon[:, :d]
    mu_ref[...] = mu[:, :hdim]
    expsc_ref[...] = exp_sc[:, :hdim]


def _round_up(n, m):
    return ((n + m - 1) // m) * m


def _pad_weight(w, rows, cols, dtype):
    out = jnp.zeros((rows, cols), jnp.float32).at[:w.shape[0], :w.shape[1]].set(w)
    return out.astype(dtype)


def _pad_bias(b, cols):
    return jnp.zeros((1, cols), jnp.float32).at[:, :b.shape[1]].set(b)


def prepare_params(params, weight_dtype=jnp.bfloat16, head_dtype=jnp.float32):
    """One-time weight prep: pad to 128 lanes, fuse [mu|sc] head, cast dtypes.

    Encoder/decoder weights go to `weight_dtype` (bf16 default, MXU-friendly);
    the fused [mu|sc] head stays `head_dtype` (f32 default) so the exp()-bound
    scale head is not quantized.  Biases are always f32 (post-accumulate add).
    """
    d, L = params["ew1"].shape
    H = params["mw"].shape[1]
    Dp, Lp, Hp = (_round_up(m, 128) for m in (d, L, H))

    wd = weight_dtype
    weights = (
        _pad_weight(params["ew1"], Dp, Lp, wd), _pad_bias(params["eb1"], Lp),
        _pad_weight(params["ew2"], Lp, Lp, wd), _pad_bias(params["eb2"], Lp),
        _pad_weight(params["ew3"], Lp, Hp, wd), _pad_bias(params["eb3"], Hp),
        # Fused [mu | sc] head: one (Hp, 2*Hp) matmul instead of two N=Hp ones.
        jnp.concatenate([_pad_weight(params["mw"], Hp, Hp, head_dtype),
                         _pad_weight(params["sw"], Hp, Hp, head_dtype)], axis=1),
        jnp.concatenate([_pad_bias(params["mb"], Hp),
                         _pad_bias(params["sb"], Hp)], axis=1),
        _pad_weight(params["dw1"], Hp, Lp, wd), _pad_bias(params["db1"], Lp),
        _pad_weight(params["dw2"], Lp, Lp, wd), _pad_bias(params["db2"], Lp),
        _pad_weight(params["dw3"], Lp, Dp, wd), _pad_bias(params["db3"], Dp),
    )
    dims = Dims(d=d, latent=L, hidden=H, dp=Dp, lp=Lp, hp=Hp)
    return weights, dims


@functools.partial(jax.jit, static_argnames=("dims", "tb_max"))
def lt_autoencoder_forward(x, eps, weights, dims, *, tb_max=1024):
    B = x.shape[0]
    d, H = dims.d, dims.hidden

    # Batch tile: as large as possible (amortize ~0.35us/grid-step) but with
    # at least 2 grid steps whenever B > 8 so both v7x TensorCores get work.
    # Ragged batches use Pallas partial blocks (rows past B are garbage-in,
    # dropped-on-write; rows are independent so this is exact for live rows).
    b8 = _round_up(B, 8)
    n_tiles = max(2, pl.cdiv(b8, tb_max)) if b8 >= 16 else 1
    tb = _round_up(pl.cdiv(b8, n_tiles), 8)
    grid = (pl.cdiv(B, tb),)

    def row_spec(cols):
        # Narrow last dim (== full array dim) is legal and maps to a
        # contiguous HBM region per block.
        return pl.BlockSpec((tb, cols), lambda i: (i, 0))

    def full_spec(shape):
        # Grid-invariant weights/biases: whole padded array resident in VMEM.
        # (Padded weights total <1.3 MiB even double-buffered; Buffered(1)
        # would shave a little VMEM on v7x but is not needed.)
        return pl.BlockSpec(shape, lambda i: (0, 0))

    in_specs = [row_spec(d), row_spec(H)] + [full_spec(w.shape) for w in weights]
    out_specs = (row_spec(d), row_spec(H), row_spec(H))
    out_shape = (jax.ShapeDtypeStruct((B, d), jnp.float32),
                 jax.ShapeDtypeStruct((B, H), jnp.float32),
                 jax.ShapeDtypeStruct((B, H), jnp.float32))

    recon, mu, exp_sc = pl.pallas_call(
        functools.partial(ltae_kernel, d=d, hdim=H, hp=dims.hp),
        grid=grid,
        in_specs=in_specs,
        out_specs=out_specs,
        out_shape=out_shape,
        scratch_shapes=[pltpu.VMEM((tb, dims.dp), jnp.float32),
                        pltpu.VMEM((tb, dims.hp), jnp.float32)],
        compiler_params=pltpu.CompilerParams(
            dimension_semantics=("parallel",),
            # Covers tb_max=1024 activations with headroom on v5e's 16 MiB
            # scoped default while staying well under v7x's 64 MiB physical.
            vmem_limit_bytes=40 * 1024 * 1024,
        ),
    )(x, eps, *weights)

    # torch.diag_embed(exp(sc)) -> (B, H, H): broadcast * eye (no per-row scatter).
    sc = exp_sc[:, :, None] * jnp.eye(H, dtype=exp_sc.dtype)
    return recon, mu, sc


def init_params(key, d, latent_dim, hidden_dim):
    """Deterministic init mirroring nn.Linear default U(-1/sqrt(fan_in), +)."""
    def linear(k, fan_in, fan_out):
        kw, kb = jax.random.split(k)
        bound = 1.0 / jnp.sqrt(jnp.float32(fan_in))
        w = jax.random.uniform(kw, (fan_in, fan_out), jnp.float32, -bound, bound)
        b = jax.random.uniform(kb, (1, fan_out), jnp.float32, -bound, bound)
        return w, b

    keys = jax.random.split(key, 8)
    p = {}
    p["ew1"], p["eb1"] = linear(keys[0], d, latent_dim)            # Encoder
    p["ew2"], p["eb2"] = linear(keys[1], latent_dim, latent_dim)
    p["ew3"], p["eb3"] = linear(keys[2], latent_dim, hidden_dim)
    p["mw"], p["mb"] = linear(keys[3], hidden_dim, hidden_dim)     # MVNormal mean
    p["sw"], p["sb"] = linear(keys[4], hidden_dim, hidden_dim)     # MVNormal scale
    p["dw1"], p["db1"] = linear(keys[5], hidden_dim, latent_dim)   # Decoder
    p["dw2"], p["db2"] = linear(keys[6], latent_dim, latent_dim)
    p["dw3"], p["db3"] = linear(keys[7], latent_dim, d)
    # TODO(synk): A, B, Qdiag and reconloss exist in the module but are unused
    # by forward(); skipped here (only used by latent_dynamics/dynamics/loss).
    return p


def reference_forward(x, eps, params):
    """Pure-JAX reference of LTAutoEncoder.forward for validation."""
    def lin(v, w, b):
        return v @ w + b
    h = jnp.maximum(lin(x, params["ew1"], params["eb1"]), 0.0)
    h = jnp.maximum(lin(h, params["ew2"], params["eb2"]), 0.0)
    latent = lin(h, params["ew3"], params["eb3"])
    mu = lin(latent, params["mw"], params["mb"])
    exp_sc = jnp.exp(lin(latent, params["sw"], params["sb"]))
    sc = jax.vmap(jnp.diag)(exp_sc)
    z = jnp.squeeze(jnp.matmul(sc, eps[..., None]), axis=-1) + mu
    g = jnp.maximum(lin(z, params["dw1"], params["db1"]), 0.0)
    g = jnp.maximum(lin(g, params["dw2"], params["db2"]), 0.0)
    recon = lin(g, params["dw3"], params["db3"])
    return recon, mu, sc


if __name__ == "__main__":
    # Small shapes consistent with LTAutoEncoder(d, latent_dim, hidden_dim).
    B, D, LATENT, HIDDEN = 16, 4, 8, 4

    key = jax.random.PRNGKey(0)
    k_params, k_x, k_eps = jax.random.split(key, 3)

    params = init_params(k_params, d=D, latent_dim=LATENT, hidden_dim=HIDDEN)
    x = jax.random.normal(k_x, (B, D), jnp.float32)
    # eps corresponds to torch.FloatTensor(mu.size()).normal_(), drawn here
    # deterministically so the kernel is reproducible.
    eps = jax.random.normal(k_eps, (B, HIDDEN), jnp.float32)

    r_ref, mu_r, sc_r = reference_forward(x, eps, params)

    # --- f32 weights everywhere: tight validation --------------------------
    w32, dims = prepare_params(params, weight_dtype=jnp.float32,
                               head_dtype=jnp.float32)
    recon, mu, sc = lt_autoencoder_forward(x, eps, w32, dims=dims)
    jax.block_until_ready((recon, mu, sc))
    assert recon.shape == (B, D) and mu.shape == (B, HIDDEN) and sc.shape == (B, HIDDEN, HIDDEN)
    assert jnp.allclose(recon, r_ref, atol=1e-4, rtol=1e-4)
    assert jnp.allclose(mu, mu_r, atol=1e-4, rtol=1e-4)
    assert jnp.allclose(sc, sc_r, atol=1e-4, rtol=1e-4)

    # --- ragged batch (exercises the partial final block) ------------------
    Br = 13
    xr, er = x[:Br], eps[:Br]
    rr_ref, mur_ref, scr_ref = reference_forward(xr, er, params)
    rr, mur, scr = lt_autoencoder_forward(xr, er, w32, dims=dims)
    jax.block_until_ready((rr, mur, scr))
    assert rr.shape == (Br, D) and mur.shape == (Br, HIDDEN)
    assert jnp.allclose(rr, rr_ref, atol=1e-4, rtol=1e-4)
    assert jnp.allclose(mur, mur_ref, atol=1e-4, rtol=1e-4)
    assert jnp.allclose(scr, scr_ref, atol=1e-4, rtol=1e-4)

    # --- default path: bf16 encoder/decoder matmuls, f32 [mu|sc] head ------
    wbf, dims_bf = prepare_params(params)
    recon_bf, mu_bf, sc_bf = lt_autoencoder_forward(x, eps, wbf, dims=dims_bf)
    jax.block_until_ready((recon_bf, mu_bf, sc_bf))
    assert bool(jnp.isfinite(recon_bf).all())
    assert jnp.allclose(recon_bf, r_ref, atol=1e-1, rtol=1e-1)
    assert jnp.allclose(mu_bf, mu_r, atol=1e-1, rtol=1e-1)
    assert jnp.allclose(sc_bf, sc_r, atol=1e-1, rtol=1e-1)

    print("KERNEL_OK")
</pallas_src>

<mosaic_0001>
module attributes {stable_mosaic.version = 11 : i64} {
  func.func @ltae_kernel(%arg0: i32, %arg1: memref<8x4xf32, #tpu.memory_space<vmem>>, %arg2: memref<8x4xf32, #tpu.memory_space<vmem>>, %arg3: memref<128x128xf32, #tpu.memory_space<vmem>>, %arg4: memref<1x128xf32, #tpu.memory_space<vmem>>, %arg5: memref<128x128xf32, #tpu.memory_space<vmem>>, %arg6: memref<1x128xf32, #tpu.memory_space<vmem>>, %arg7: memref<128x128xf32, #tpu.memory_space<vmem>>, %arg8: memref<1x128xf32, #tpu.memory_space<vmem>>, %arg9: memref<128x256xf32, #tpu.memory_space<vmem>>, %arg10: memref<1x256xf32, #tpu.memory_space<vmem>>, %arg11: memref<128x128xf32, #tpu.memory_space<vmem>>, %arg12: memref<1x128xf32, #tpu.memory_space<vmem>>, %arg13: memref<128x128xf32, #tpu.memory_space<vmem>>, %arg14: memref<1x128xf32, #tpu.memory_space<vmem>>, %arg15: memref<128x128xf32, #tpu.memory_space<vmem>>, %arg16: memref<1x128xf32, #tpu.memory_space<vmem>>, %arg17: memref<8x4xf32, #tpu.memory_space<vmem>>, %arg18: memref<8x4xf32, #tpu.memory_space<vmem>>, %arg19: memref<8x4xf32, #tpu.memory_space<vmem>>, %arg20: memref<8x128xf32, #tpu.memory_space<vmem>>, %arg21: memref<8x128xf32, #tpu.memory_space<vmem>>) attributes {dimension_semantics = [#tpu.dimension_semantics<parallel>], iteration_bounds = array<i64: 2>, scalar_prefetch = 0 : i64, scratch_operands = 2 : i64, tpu.core_type = #tpu.core_type<tc>, window_params = [{transform_indices = @transform_0, window_bounds = array<i64: 8, 4>}, {transform_indices = @transform_1, window_bounds = array<i64: 8, 4>}, {pipeline_mode = #tpu.pipeline_mode<synchronous>, transform_indices = @transform_2, window_bounds = array<i64: 128, 128>}, {pipeline_mode = #tpu.pipeline_mode<synchronous>, transform_indices = @transform_3, window_bounds = array<i64: 1, 128>}, {pipeline_mode = #tpu.pipeline_mode<synchronous>, transform_indices = @transform_4, window_bounds = array<i64: 128, 128>}, {pipeline_mode = #tpu.pipeline_mode<synchronous>, transform_indices = @transform_5, window_bounds = array<i64: 1, 128>}, {pipeline_mode = #tpu.pipeline_mode<synchronous>, transform_indices = @transform_6, window_bounds = array<i64: 128, 128>}, {pipeline_mode = #tpu.pipeline_mode<synchronous>, transform_indices = @transform_7, window_bounds = array<i64: 1, 128>}, {pipeline_mode = #tpu.pipeline_mode<synchronous>, transform_indices = @transform_8, window_bounds = array<i64: 128, 256>}, {pipeline_mode = #tpu.pipeline_mode<synchronous>, transform_indices = @transform_9, window_bounds = array<i64: 1, 256>}, {pipeline_mode = #tpu.pipeline_mode<synchronous>, transform_indices = @transform_10, window_bounds = array<i64: 128, 128>}, {pipeline_mode = #tpu.pipeline_mode<synchronous>, transform_indices = @transform_11, window_bounds = array<i64: 1, 128>}, {pipeline_mode = #tpu.pipeline_mode<synchronous>, transform_indices = @transform_12, window_bounds = array<i64: 128, 128>}, {pipeline_mode = #tpu.pipeline_mode<synchronous>, transform_indices = @transform_13, window_bounds = array<i64: 1, 128>}, {pipeline_mode = #tpu.pipeline_mode<synchronous>, transform_indices = @transform_14, window_bounds = array<i64: 128, 128>}, {pipeline_mode = #tpu.pipeline_mode<synchronous>, transform_indices = @transform_15, window_bounds = array<i64: 1, 128>}, {transform_indices = @transform_16, window_bounds = array<i64: 8, 4>}, {transform_indices = @transform_17, window_bounds = array<i64: 8, 4>}, {transform_indices = @transform_18, window_bounds = array<i64: 8, 4>}]} {
    %cst = arith.constant 0.000000e+00 : f32
    %0 = vector.broadcast %cst : f32 to vector<8x128xf32>
    %c0 = arith.constant 0 : index
    %c0_0 = arith.constant 0 : index
    %1 = vector.load %arg20[%c0, %c0_0] : memref<8x128xf32, #tpu.memory_space<vmem>>, vector<8x128xf32>
    tpu.vector_store %arg20[%c0, %c0_0], %0 {strides = array<i32>} : memref<8x128xf32, #tpu.memory_space<vmem>>, vector<8x128xf32>,
    %c0_1 = arith.constant 0 : index
    %c0_2 = arith.constant 0 : index
    %2 = vector.load %arg1[%c0_1, %c0_2] : memref<8x4xf32, #tpu.memory_space<vmem>>, vector<8x4xf32>
    %c0_3 = arith.constant 0 : index
    %c0_4 = arith.constant 0 : index
    %3 = vector.load %arg20[%c0_3, %c0_4] : memref<8x128xf32, #tpu.memory_space<vmem>>, vector<8x4xf32>
    tpu.vector_store %arg20[%c0_3, %c0_4], %2 {strides = array<i32>} : memref<8x128xf32, #tpu.memory_space<vmem>>, vector<8x4xf32>,
    %cst_5 = arith.constant 0.000000e+00 : f32
    %4 = vector.broadcast %cst_5 : f32 to vector<8x128xf32>
    %c0_6 = arith.constant 0 : index
    %c0_7 = arith.constant 0 : index
    %5 = vector.load %arg21[%c0_6, %c0_7] : memref<8x128xf32, #tpu.memory_space<vmem>>, vector<8x128xf32>
    tpu.vector_store %arg21[%c0_6, %c0_7], %4 {strides = array<i32>} : memref<8x128xf32, #tpu.memory_space<vmem>>, vector<8x128xf32>,
    %c0_8 = arith.constant 0 : index
    %c0_9 = arith.constant 0 : index
    %6 = vector.load %arg2[%c0_8, %c0_9] : memref<8x4xf32, #tpu.memory_space<vmem>>, vector<8x4xf32>
    %c0_10 = arith.constant 0 : index
    %c0_11 = arith.constant 0 : index
    %7 = vector.load %arg21[%c0_10, %c0_11] : memref<8x128xf32, #tpu.memory_space<vmem>>, vector<8x4xf32>
    tpu.vector_store %arg21[%c0_10, %c0_11], %6 {strides = array<i32>} : memref<8x128xf32, #tpu.memory_space<vmem>>, vector<8x4xf32>,
    %c0_12 = arith.constant 0 : index
    %c0_13 = arith.constant 0 : index
    %8 = vector.load %arg20[%c0_12, %c0_13] : memref<8x128xf32, #tpu.memory_space<vmem>>, vector<8x128xf32>
    %c0_14 = arith.constant 0 : index
    %c0_15 = arith.constant 0 : index
    %9 = vector.load %arg3[%c0_14, %c0_15] : memref<128x128xf32, #tpu.memory_space<vmem>>, vector<128x128xf32>
    %cst_16 = arith.constant dense<0.000000e+00> : vector<8x128xf32>
    %10 = tpu.matmul %8, %9, %cst_16 {dimension_numbers = #tpu.dot_dimension_numbers<[1], [0], [0], [1], [0, 0, 1, 1], [], []>} : vector<8x128xf32>, vector<128x128xf32>, vector<8x128xf32> -> vector<8x128xf32>
    %c0_17 = arith.constant 0 : index
    %c0_18 = arith.constant 0 : index
    %11 = vector.load %arg4[%c0_17, %c0_18] : memref<1x128xf32, #tpu.memory_space<vmem>>, vector<1x128xf32>
    %12 = vector.broadcast %11 : vector<1x128xf32> to vector<8x128xf32>
    %13 = arith.addf %10, %12 : vector<8x128xf32>
    %cst_19 = arith.constant 0.000000e+00 : f32
    %14 = vector.broadcast %cst_19 : f32 to vector<8x128xf32>
    %15 = arith.maximumf %13, %14 : vector<8x128xf32>
    %c0_20 = arith.constant 0 : index
    %c0_21 = arith.constant 0 : index
    %16 = vector.load %arg5[%c0_20, %c0_21] : memref<128x128xf32, #tpu.memory_space<vmem>>, vector<128x128xf32>
    %cst_22 = arith.constant dense<0.000000e+00> : vector<8x128xf32>
    %17 = tpu.matmul %15, %16, %cst_22 {dimension_numbers = #tpu.dot_dimension_numbers<[1], [0], [0], [1], [0, 0, 1, 1], [], []>} : vector<8x128xf32>, vector<128x128xf32>, vector<8x128xf32> -> vector<8x128xf32>
    %c0_23 = arith.constant 0 : index
    %c0_24 = arith.constant 0 : index
    %18 = vector.load %arg6[%c0_23, %c0_24] : memref<1x128xf32, #tpu.memory_space<vmem>>, vector<1x128xf32>
    %19 = vector.broadcast %18 : vector<1x128xf32> to vector<8x128xf32>
    %20 = arith.addf %17, %19 : vector<8x128xf32>
    %cst_25 = arith.constant 0.000000e+00 : f32
    %21 = vector.broadcast %cst_25 : f32 to vector<8x128xf32>
    %22 = arith.maximumf %20, %21 : vector<8x128xf32>
    %c0_26 = arith.constant 0 : index
    %c0_27 = arith.constant 0 : index
    %23 = vector.load %arg7[%c0_26, %c0_27] : memref<128x128xf32, #tpu.memory_space<vmem>>, vector<128x128xf32>
    %cst_28 = arith.constant dense<0.000000e+00> : vector<8x128xf32>
    %24 = tpu.matmul %22, %23, %cst_28 {dimension_numbers = #tpu.dot_dimension_numbers<[1], [0], [0], [1], [0, 0, 1, 1], [], []>} : vector<8x128xf32>, vector<128x128xf32>, vector<8x128xf32> -> vector<8x128xf32>
    %c0_29 = arith.constant 0 : index
    %c0_30 = arith.constant 0 : index
    %25 = vector.load %arg8[%c0_29, %c0_30] : memref<1x128xf32, #tpu.memory_space<vmem>>, vector<1x128xf32>
    %26 = vector.broadcast %25 : vector<1x128xf32> to vector<8x128xf32>
    %27 = arith.addf %24, %26 : vector<8x128xf32>
    %c0_31 = arith.constant 0 : index
    %c0_32 = arith.constant 0 : index
    %28 = vector.load %arg9[%c0_31, %c0_32] : memref<128x256xf32, #tpu.memory_space<vmem>>, vector<128x256xf32>
    %cst_33 = arith.constant dense<0.000000e+00> : vector<8x256xf32>
    %29 = tpu.matmul %27, %28, %cst_33 {dimension_numbers = #tpu.dot_dimension_numbers<[1], [0], [0], [1], [0, 0, 1, 1], [], []>} : vector<8x128xf32>, vector<128x256xf32>, vector<8x256xf32> -> vector<8x256xf32>
    %c0_34 = arith.constant 0 : index
    %c0_35 = arith.constant 0 : index
    %30 = vector.load %arg10[%c0_34, %c0_35] : memref<1x256xf32, #tpu.memory_space<vmem>>, vector<1x256xf32>
    %31 = vector.broadcast %30 : vector<1x256xf32> to vector<8x256xf32>
    %32 = arith.addf %29, %31 : vector<8x256xf32>
    %33 = vector.extract_strided_slice %32 {offsets = [0, 0], sizes = [8, 128], strides = [1, 1]} : vector<8x256xf32> to vector<8x128xf32>
    %34 = vector.extract_strided_slice %32 {offsets = [0, 128], sizes = [8, 128], strides = [1, 1]} : vector<8x256xf32> to vector<8x128xf32>
    %35 = math.exp %34 : vector<8x128xf32>
    %c0_36 = arith.constant 0 : index
    %c0_37 = arith.constant 0 : index
    %36 = vector.load %arg21[%c0_36, %c0_37] : memref<8x128xf32, #tpu.memory_space<vmem>>, vector<8x128xf32>
    %37 = arith.mulf %35, %36 : vector<8x128xf32>
    %38 = arith.addf %37, %33 : vector<8x128xf32>
    %c0_38 = arith.constant 0 : index
    %c0_39 = arith.constant 0 : index
    %39 = vector.load %arg11[%c0_38, %c0_39] : memref<128x128xf32, #tpu.memory_space<vmem>>, vector<128x128xf32>
    %cst_40 = arith.constant dense<0.000000e+00> : vector<8x128xf32>
    %40 = tpu.matmul %38, %39, %cst_40 {dimension_numbers = #tpu.dot_dimension_numbers<[1], [0], [0], [1], [0, 0, 1, 1], [], []>} : vector<8x128xf32>, vector<128x128xf32>, vector<8x128xf32> -> vector<8x128xf32>
    %c0_41 = arith.constant 0 : index
    %c0_42 = arith.constant 0 : index
    %41 = vector.load %arg12[%c0_41, %c0_42] : memref<1x128xf32, #tpu.memory_space<vmem>>, vector<1x128xf32>
    %42 = vector.broadcast %41 : vector<1x128xf32> to vector<8x128xf32>
    %43 = arith.addf %40, %42 : vector<8x128xf32>
    %cst_43 = arith.constant 0.000000e+00 : f32
    %44 = vector.broadcast %cst_43 : f32 to vector<8x128xf32>
    %45 = arith.maximumf %43, %44 : vector<8x128xf32>
    %c0_44 = arith.constant 0 : index
    %c0_45 = arith.constant 0 : index
    %46 = vector.load %arg13[%c0_44, %c0_45] : memref<128x128xf32, #tpu.memory_space<vmem>>, vector<128x128xf32>
    %cst_46 = arith.constant dense<0.000000e+00> : vector<8x128xf32>
    %47 = tpu.matmul %45, %46, %cst_46 {dimension_numbers = #tpu.dot_dimension_numbers<[1], [0], [0], [1], [0, 0, 1, 1], [], []>} : vector<8x128xf32>, vector<128x128xf32>, vector<8x128xf32> -> vector<8x128xf32>
    %c0_47 = arith.constant 0 : index
    %c0_48 = arith.constant 0 : index
    %48 = vector.load %arg14[%c0_47, %c0_48] : memref<1x128xf32, #tpu.memory_space<vmem>>, vector<1x128xf32>
    %49 = vector.broadcast %48 : vector<1x128xf32> to vector<8x128xf32>
    %50 = arith.addf %47, %49 : vector<8x128xf32>
    %cst_49 = arith.constant 0.000000e+00 : f32
    %51 = vector.broadcast %cst_49 : f32 to vector<8x128xf32>
    %52 = arith.maximumf %50, %51 : vector<8x128xf32>
    %c0_50 = arith.constant 0 : index
    %c0_51 = arith.constant 0 : index
    %53 = vector.load %arg15[%c0_50, %c0_51] : memref<128x128xf32, #tpu.memory_space<vmem>>, vector<128x128xf32>
    %cst_52 = arith.constant dense<0.000000e+00> : vector<8x128xf32>
    %54 = tpu.matmul %52, %53, %cst_52 {dimension_numbers = #tpu.dot_dimension_numbers<[1], [0], [0], [1], [0, 0, 1, 1], [], []>} : vector<8x128xf32>, vector<128x128xf32>, vector<8x128xf32> -> vector<8x128xf32>
    %c0_53 = arith.constant 0 : index
    %c0_54 = arith.constant 0 : index
    %55 = vector.load %arg16[%c0_53, %c0_54] : memref<1x128xf32, #tpu.memory_space<vmem>>, vector<1x128xf32>
    %56 = vector.broadcast %55 : vector<1x128xf32> to vector<8x128xf32>
    %57 = arith.addf %54, %56 : vector<8x128xf32>
    %58 = vector.extract_strided_slice %57 {offsets = [0, 0], sizes = [8, 4], strides = [1, 1]} : vector<8x128xf32> to vector<8x4xf32>
    %c0_55 = arith.constant 0 : index
    %c0_56 = arith.constant 0 : index
    %59 = vector.load %arg17[%c0_55, %c0_56] : memref<8x4xf32, #tpu.memory_space<vmem>>, vector<8x4xf32>
    tpu.vector_store %arg17[%c0_55, %c0_56], %58 {strides = array<i32>} : memref<8x4xf32, #tpu.memory_space<vmem>>, vector<8x4xf32>,
    %60 = vector.extract_strided_slice %33 {offsets = [0, 0], sizes = [8, 4], strides = [1, 1]} : vector<8x128xf32> to vector<8x4xf32>
    %c0_57 = arith.constant 0 : index
    %c0_58 = arith.constant 0 : index
    %61 = vector.load %arg18[%c0_57, %c0_58] : memref<8x4xf32, #tpu.memory_space<vmem>>, vector<8x4xf32>
    tpu.vector_store %arg18[%c0_57, %c0_58], %60 {strides = array<i32>} : memref<8x4xf32, #tpu.memory_space<vmem>>, vector<8x4xf32>,
    %62 = vector.extract_strided_slice %35 {offsets = [0, 0], sizes = [8, 4], strides = [1, 1]} : vector<8x128xf32> to vector<8x4xf32>
    %c0_59 = arith.constant 0 : index
    %c0_60 = arith.constant 0 : index
    %63 = vector.load %arg19[%c0_59, %c0_60] : memref<8x4xf32, #tpu.memory_space<vmem>>, vector<8x4xf32>
    tpu.vector_store %arg19[%c0_59, %c0_60], %62 {strides = array<i32>} : memref<8x4xf32, #tpu.memory_space<vmem>>, vector<8x4xf32>,
    return
  }
  func.func @transform_0(%arg0: i32) -> (i32, i32) {
    %c0_i32 = arith.constant 0 : i32
    %c0_i32_0 = arith.constant 0 : i32
    return %arg0, %c0_i32 : i32, i32
  }
  func.func @transform_1(%arg0: i32) -> (i32, i32) {
    %c0_i32 = arith.constant 0 : i32
    %c0_i32_0 = arith.constant 0 : i32
    return %arg0, %c0_i32 : i32, i32
  }
  func.func @transform_2(%arg0: i32) -> (i32, i32) {
    %c0_i32 = arith.constant 0 : i32
    %c0_i32_0 = arith.constant 0 : i32
    %c0_i32_1 = arith.constant 0 : i32
    return %c0_i32, %c0_i32_0 : i32, i32
  }
  func.func @transform_3(%arg0: i32) -> (i32, i32) {
    %c0_i32 = arith.constant 0 : i32
    %c0_i32_0 = arith.constant 0 : i32
    %c0_i32_1 = arith.constant 0 : i32
    return %c0_i32, %c0_i32_0 : i32, i32
  }
  func.func @transform_4(%arg0: i32) -> (i32, i32) {
    %c0_i32 = arith.constant 0 : i32
    %c0_i32_0 = arith.constant 0 : i32
    %c0_i32_1 = arith.constant 0 : i32
    return %c0_i32, %c0_i32_0 : i32, i32
  }
  func.func @transform_5(%arg0: i32) -> (i32, i32) {
    %c0_i32 = arith.constant 0 : i32
    %c0_i32_0 = arith.constant 0 : i32
    %c0_i32_1 = arith.constant 0 : i32
    return %c0_i32, %c0_i32_0 : i32, i32
  }
  func.func @transform_6(%arg0: i32) -> (i32, i32) {
    %c0_i32 = arith.constant 0 : i32
    %c0_i32_0 = arith.constant 0 : i32
    %c0_i32_1 = arith.constant 0 : i32
    return %c0_i32, %c0_i32_0 : i32, i32
  }
  func.func @transform_7(%arg0: i32) -> (i32, i32) {
    %c0_i32 = arith.constant 0 : i32
    %c0_i32_0 = arith.constant 0 : i32
    %c0_i32_1 = arith.constant 0 : i32
    return %c0_i32, %c0_i32_0 : i32, i32
  }
  func.func @transform_8(%arg0: i32) -> (i32, i32) {
    %c0_i32 = arith.constant 0 : i32
    %c0_i32_0 = arith.constant 0 : i32
    %c0_i32_1 = arith.constant 0 : i32
    return %c0_i32, %c0_i32_0 : i32, i32
  }
  func.func @transform_9(%arg0: i32) -> (i32, i32) {
    %c0_i32 = arith.constant 0 : i32
    %c0_i32_0 = arith.constant 0 : i32
    %c0_i32_1 = arith.constant 0 : i32
    return %c0_i32, %c0_i32_0 : i32, i32
  }
  func.func @transform_10(%arg0: i32) -> (i32, i32) {
    %c0_i32 = arith.constant 0 : i32
    %c0_i32_0 = arith.constant 0 : i32
    %c0_i32_1 = arith.constant 0 : i32
    return %c0_i32, %c0_i32_0 : i32, i32
  }
  func.func @transform_11(%arg0: i32) -> (i32, i32) {
    %c0_i32 = arith.constant 0 : i32
    %c0_i32_0 = arith.constant 0 : i32
    %c0_i32_1 = arith.constant 0 : i32
    return %c0_i32, %c0_i32_0 : i32, i32
  }
  func.func @transform_12(%arg0: i32) -> (i32, i32) {
    %c0_i32 = arith.constant 0 : i32
    %c0_i32_0 = arith.constant 0 : i32
    %c0_i32_1 = arith.constant 0 : i32
    return %c0_i32, %c0_i32_0 : i32, i32
  }
  func.func @transform_13(%arg0: i32) -> (i32, i32) {
    %c0_i32 = arith.constant 0 : i32
    %c0_i32_0 = arith.constant 0 : i32
    %c0_i32_1 = arith.constant 0 : i32
    return %c0_i32, %c0_i32_0 : i32, i32
  }
  func.func @transform_14(%arg0: i32) -> (i32, i32) {
    %c0_i32 = arith.constant 0 : i32
    %c0_i32_0 = arith.constant 0 : i32
    %c0_i32_1 = arith.constant 0 : i32
    return %c0_i32, %c0_i32_0 : i32, i32
  }
  func.func @transform_15(%arg0: i32) -> (i32, i32) {
    %c0_i32 = arith.constant 0 : i32
    %c0_i32_0 = arith.constant 0 : i32
    %c0_i32_1 = arith.constant 0 : i32
    return %c0_i32, %c0_i32_0 : i32, i32
  }
  func.func @transform_16(%arg0: i32) -> (i32, i32) {
    %c0_i32 = arith.constant 0 : i32
    %c0_i32_0 = arith.constant 0 : i32
    return %arg0, %c0_i32 : i32, i32
  }
  func.func @transform_17(%arg0: i32) -> (i32, i32) {
    %c0_i32 = arith.constant 0 : i32
    %c0_i32_0 = arith.constant 0 : i32
    return %arg0, %c0_i32 : i32, i32
  }
  func.func @transform_18(%arg0: i32) -> (i32, i32) {
    %c0_i32 = arith.constant 0 : i32
    %c0_i32_0 = arith.constant 0 : i32
    return %arg0, %c0_i32 : i32, i32
  }
}

</mosaic_0001>

<bundles_post_ra>
// kernel: lt_autoencoder_forward.1
= control target key start
LH: loop header
LB: loop body
LE: loop exit
PB: predicated region body
PF: predicated region fallthrough
CT: control target
= control target key end

     0   :  { %s2633_s0 = inlined_call_operand.vmem [shape: f32[16,4], index: 0, kind: input, shape index: {}]   ;;  %s2634_s1 = inlined_call_operand.vmem [shape: f32[16,4], index: 1, kind: input, shape index: {}]   ;;  %s2635_s2 = inlined_call_operand.hbm [shape: f32[128,128], index: 2, kind: input, shape index: {}]   ;;  %s2636_s3 = inlined_call_operand.vmem [shape: f32[1,128], index: 3, kind: input, shape index: {}]   ;;  %s2637_s4 = inlined_call_operand.hbm [shape: f32[128,128], index: 4, kind: input, shape index: {}]   ;;  %s2638_s5 = inlined_call_operand.vmem [shape: f32[1,128], index: 5, kind: input, shape index: {}]   ;;  %s2639_s6 = inlined_call_operand.hbm [shape: f32[128,128], index: 6, kind: input, shape index: {}]   ;;  %s2640_s7 = inlined_call_operand.vmem [shape: f32[1,128], index: 7, kind: input, shape index: {}]   ;;  %s2641_s8 = inlined_call_operand.hbm [shape: f32[128,256], index: 8, kind: input, shape index: {}]   ;;  %s2642_s9 = inlined_call_operand.vmem [shape: f32[1,256], index: 9, kind: input, shape index: {}]   ;;  %s2643_s10 = inlined_call_operand.hbm [shape: f32[128,128], index: 10, kind: input, shape index: {}]   ;;  %s2644_s11 = inlined_call_operand.vmem [shape: f32[1,128], index: 11, kind: input, shape index: {}]   ;;  %s2645_s12 = inlined_call_operand.hbm [shape: f32[128,128], index: 12, kind: input, shape index: {}]   ;;  %s2646_s13 = inlined_call_operand.vmem [shape: f32[1,128], index: 13, kind: input, shape index: {}]   ;;  %s2647_s14 = inlined_call_operand.hbm [shape: f32[128,128], index: 14, kind: input, shape index: {}]   ;;  %s2648_s15 = inlined_call_operand.vmem [shape: f32[1,128], index: 15, kind: input, shape index: {}]   ;;  %s2649_s16 = inlined_call_operand.vmem [shape: f32[16,4], index: 16, kind: output, shape index: {0}]   ;;  %s2650_s17 = inlined_call_operand.vmem [shape: f32[16,4], index: 17, kind: output, shape index: {1}]   ;;  %s2651_s18 = inlined_call_operand.vmem [shape: f32[16,4], index: 18, kind: output, shape index: {2}]  }
   0x1   :  { %2656 = sst [smem:[#allocation19_spill]] %s2633_s0 }
   0x2   :  { %2657 = sst [smem:[#allocation20_spill]] %s2634_s1 }
   0x3   :  { %2658 = sst [smem:[#allocation21_spill]] %s2635_s2 }
   0x4   :  { %2659 = sst [smem:[#allocation22_spill]] %s2637_s4 }
   0x5   :  { %2660 = sst [smem:[#allocation23_spill]] %s2641_s8 }
   0x6   :  { %24 = vsyncpa [#allocation5], 0 }
   0x7   :  { %25 = vsyncpa [#allocation7], 0 }
   0x8   :  { %26 = vsyncpa [#allocation10], 0 }
   0x9   :  { %27 = vsyncpa [#allocation13], 0  ;;  %s2345_s27 = smov 0  }
   0xa LB: > { %s2351_s28 = sadd.s32 4294967295, %s2235_s27   ;;  %p1602_p0 = scmp.ge.s32.totalorder %s2235_s27, 1  ;;  %s2235_s27 = sphi %s2345_s27, %s33_s27  }
   0xb   : > { %p462_p1 = scmp.lt.s32.totalorder %s2235_s27, 3  ;;  %p1994_p2 = scmp.eq.s32.totalorder %s2351_s28, 0 }
   0xc   : > { %s2237_s30 = smov [#allocation6]   ;;  %s2238_s19 = smov [#allocation9]  }
   0xd   : > { %p2356_p3 = pnand %p1602_p0, %p462_p1  ;;  %s490_s0 = sshll.u32 %s2237_s30, 4  ;;  %s491_s0 = int_to_ptr.vmem [resolvable:$true] %s490_s0 }
   0xe   : > { %s522_s1 = sshll.u32 %s2238_s19, 4  ;;  %s2239_s21 = smov [#allocation12]   ;;  %s2362_s1 = int_to_ptr.vmem [resolvable:$true] %s522_s1 }
   0xf   : > { %p1972_p4 = pneg %p2356_p3  ;;  %s2370_s22 = sshll.u32 %s2239_s21, 4  ;;  %s555_s22 = int_to_ptr.vmem [resolvable:$true] %s2370_s22 }
  0x10   : > { %s2042_s23 = scalar_lea.vmem %s491_s0, 2048  ;;  %p2050_p10 = scmp.lt.s32.totalorder %s491_s0, %s491_s0 }
  0x11   : > { %p2366_p5 = pnand %p1994_p2, %p1972_p4  ;;  %p2043_p7 = scmp.ne.s32.totalorder %s491_s0, %s2042_s23 }
  0x12   : > { %p2051_p11 = scmp.lt.s32.totalorder %s2042_s23, %s2042_s23 }
  0x13   : > { %p2374_p6 = pneg %p2366_p5 }
  0x14   : > { %p2052_p12 = por %p2051_p11, %p2050_p10 }
  0x15   : > { %p2045_p8 = pnand %p2043_p7, %p2374_p6 }
  0x17   : > { %p2046_p9 = pneg %p2045_p8 }
  0x19   : > { %p2053_p13 = pnand %p2052_p12, %p2046_p9 }
  0x1b   : > { %2056 = shalt.err (!%p2053_p13)
}
  0x1c   : > { %s2652_s24 = smov 128   ;;  %s2654_s25 = smov 8  }
  0x1d   : > { %s2664_s4 = sld [smem:[#allocation22_spill]]  ;;  %s2068_s19 = scalar_lea.vmem %s2362_s1, 4096 }
  0x1e   : > { %p2069_p0 = scmp.ne.s32.totalorder %s2362_s1, %s2068_s19  ;;  %p2076_p7 = scmp.lt.s32.totalorder %s2362_s1, %s2362_s1 }
  0x1f   : > { %p2077_p8 = scmp.lt.s32.totalorder %s2068_s19, %s2068_s19 }
  0x20   : > { %p2071_p1 = pnand %p2069_p0, %p2374_p6 }
  0x21   : > { %p2078_p9 = por %p2077_p8, %p2076_p7 }
  0x22   : > { %p2072_p4 = pneg %p2071_p1 }
  0x23   : > { %1978 = dma.hbm_to_vmem [thread:$0]  (!%p2366_p5), %s2664_s4, 2048, %s491_s0, [#allocation7], %s2652_s24, %s2652_s24, %s2654_s25  }
  0x24   : > { %p2079_p10 = pnand %p2078_p9, %p2072_p4 }
  0x26   : > { %2082 = shalt.err (!%p2079_p10)
}
  0x27   : > { %s2242_s21 = smov 256   ;;  %s2243_s23 = smov 16  }
  0x28   : > { %s2665_s8 = sld [smem:[#allocation23_spill]]  ;;  %s2244_s30 = smov [#allocation4]  }
  0x29   : > { %s474_s24 = sshll.u32 %s2244_s30, 4  ;;  %s2094_s25 = scalar_lea.vmem %s555_s22, 2048  ;;  %s475_s24 = int_to_ptr.vmem [resolvable:$true] %s474_s24 }
  0x2a   : > { %p2095_p11 = scmp.ne.s32.totalorder %s555_s22, %s2094_s25  ;;  %p2102_p0 = scmp.lt.s32.totalorder %s555_s22, %s555_s22 }
  0x2b   : > { %p2103_p1 = scmp.lt.s32.totalorder %s2094_s25, %s2094_s25 }
  0x2c   : > { %p2097_p12 = pnand %p2095_p11, %p2374_p6 }
  0x2d   : > { %p2104_p4 = por %p2103_p1, %p2102_p0 }
  0x2e   : > { %1984 = dma.hbm_to_vmem [thread:$0]  (!%p2366_p5), %s2665_s8, 4096, %s2362_s1, [#allocation10], %s2242_s21, %s2242_s21, %s2243_s23  }
  0x2f   : > { %p2098_p13 = pneg %p2097_p12 }
  0x31   : > { %p2105_p7 = pnand %p2104_p4, %p2098_p13 }
  0x33   : > { %2108 = shalt.err (!%p2105_p7)
}
  0x34   : > { %s2666_s19 = smov 8   ;;  %s2667_s4 = smov 128  }
  0x35   : > { %1990 = dma.hbm_to_vmem [thread:$0]  (!%p2366_p5), %s2645_s12, 2048, %s555_s22, [#allocation13], %s2667_s4, %s2667_s4, %s2666_s19  }
  0x36   : > { %s2120_s21 = scalar_lea.vmem %s475_s24, 2048  ;;  %p2128_p11 = scmp.lt.s32.totalorder %s475_s24, %s475_s24 }
  0x37   : > { %p2121_p8 = scmp.ne.s32.totalorder %s475_s24, %s2120_s21  ;;  %p2129_p12 = scmp.lt.s32.totalorder %s2120_s21, %s2120_s21 }
  0x39   : > { %p2123_p9 = pnand %p2121_p8, %p2374_p6  ;;  %p2130_p13 = por %p2129_p12, %p2128_p11 }
  0x3b   : > { %p2124_p10 = pneg %p2123_p9 }
  0x3d   : > { %p2131_p0 = pnand %p2130_p13, %p2124_p10 }
  0x3f   : > { %2134 = shalt.err (!%p2131_p0)
}
  0x40   : > { %s2668_s0 = sld [smem:[#allocation21_spill]]  ;;  %s2245_s22 = smov [#allocation8]  }
  0x41   : > { %s506_s30 = sshll.u32 %s2245_s22, 4  ;;  %s2246_s26 = smov [#allocation11]   ;;  %s507_s30 = int_to_ptr.vmem [resolvable:$true] %s506_s30 }
  0x42   : > { %s538_s1 = sshll.u32 %s2246_s26, 4  ;;  %s2146_s8 = scalar_lea.vmem %s507_s30, 2048  ;;  %s539_s1 = int_to_ptr.vmem [resolvable:$true] %s538_s1 }
  0x43   : > { %p2147_p1 = scmp.ne.s32.totalorder %s507_s30, %s2146_s8  ;;  %p2154_p8 = scmp.lt.s32.totalorder %s507_s30, %s507_s30 }
  0x44   : > { %p2155_p9 = scmp.lt.s32.totalorder %s2146_s8, %s2146_s8 }
  0x45   : > { %p2149_p4 = pnand %p2147_p1, %p2374_p6 }
  0x46   : > { %1975 = dma.hbm_to_vmem [thread:$0]  (!%p2366_p5), %s2668_s0, 2048, %s475_s24, [#allocation5], %s2667_s4, %s2667_s4, %s2666_s19  }
  0x47   : > { %p2150_p7 = pneg %p2149_p4  ;;  %p2156_p10 = por %p2155_p9, %p2154_p8 }
  0x49   : > { %p2157_p11 = pnand %p2156_p10, %p2150_p7 }
  0x4b   : > { %2160 = shalt.err (!%p2157_p11)
}
  0x4c   : > { %1981 = dma.hbm_to_vmem [thread:$0]  (!%p2366_p5), %s2639_s6, 2048, %s507_s30, [#allocation7], %s2667_s4, %s2667_s4, %s2666_s19  }
  0x4d   : > { %s2172_s25 = scalar_lea.vmem %s539_s1, 2048  ;;  %p2180_p1 = scmp.lt.s32.totalorder %s539_s1, %s539_s1 }
  0x4e   : > { %p2173_p12 = scmp.ne.s32.totalorder %s539_s1, %s2172_s25  ;;  %p2181_p4 = scmp.lt.s32.totalorder %s2172_s25, %s2172_s25 }
  0x50   : > { %p2175_p13 = pnand %p2173_p12, %p2374_p6  ;;  %p2182_p7 = por %p2181_p4, %p2180_p1 }
  0x52   : > { %p2176_p0 = pneg %p2175_p13 }
  0x54   : > { %p2183_p8 = pnand %p2182_p7, %p2176_p0 }
  0x56   : > { %2186 = shalt.err (!%p2183_p8)
}
  0x57   : > { %1987 = dma.hbm_to_vmem [thread:$0]  (!%p2366_p5), %s2643_s10, 2048, %s539_s1, [#allocation10], %s2667_s4, %s2667_s4, %s2666_s19  }
  0x58   : > { %s2247_s0 = smov [#allocation14]  }
  0x59   : > { %s570_s22 = sshll.u32 %s2247_s0, 4  ;;  %s571_s22 = int_to_ptr.vmem [resolvable:$true] %s570_s22 }
  0x5a   : > { %s2198_s30 = scalar_lea.vmem %s571_s22, 2048  ;;  %p2206_p12 = scmp.lt.s32.totalorder %s571_s22, %s571_s22 }
  0x5b   : > { %p2199_p9 = scmp.ne.s32.totalorder %s571_s22, %s2198_s30  ;;  %p2207_p13 = scmp.lt.s32.totalorder %s2198_s30, %s2198_s30 }
  0x5d   : > { %p2201_p10 = pnand %p2199_p9, %p2374_p6  ;;  %p2208_p0 = por %p2207_p13, %p2206_p12 }
  0x5f   : > { %p2202_p11 = pneg %p2201_p10 }
  0x61   : > { %p2209_p1 = pnand %p2208_p0, %p2202_p11 }
  0x63   : > { %2212 = shalt.err (!%p2209_p1)
}
  0x64   : > { %1993 = dma.hbm_to_vmem [thread:$0]  (!%p2366_p5), %s2647_s14, 2048, %s571_s22, [#allocation13], %s2667_s4, %s2667_s4, %s2666_s19  }
  0x65   : > { %603 = sbr.rel (%p2356_p3) target bundleno = 1543 (0x607), region = 84 }
  0x6a   : > { %2218 = dma.done.wait (%p1994_p2), [#allocation5], 2048  }
  0x6b   : > { %2220 = vsyncadd (%p1994_p2), [#allocation5], 4294965248 }
  0x6c   : > { %2222 = dma.done.wait (%p1994_p2), [#allocation7], 4096  }
  0x6d   : > { %2224 = vsyncadd (%p1994_p2), [#allocation7], 4294963200 }
  0x6e   : > { %2226 = dma.done.wait (%p1994_p2), [#allocation10], 6144  }
  0x6f   : > { %2228 = vsyncadd (%p1994_p2), [#allocation10], 4294961152 }
  0x70   : > { %2230 = dma.done.wait (%p1994_p2), [#allocation13], 4096  }
  0x71   : > { %2232 = vsyncadd (%p1994_p2), [#allocation13], 4294963200  ;;  %p691_p3 = scmp.lt.s32.totalorder %s2351_s28, 1  ;;  %v2248_v0 = vmov 0.0   ;;  %vm2249_vm0 = vmmov 0   ;;  %v734_v1 = vld [vmem:[#allocation4 + $0x78] sm:$0xff] }
  0x72   : > { %1734 = vmatprep.subr.mxu0 %v2248_v0  ;;  %711 = vst [vmem:[#allocation2] sm:$0xff] %v2248_v0  ;;  %715 = vst [vmem:[#allocation3] sm:$0xff] %v2248_v0  ;;  %1766 = vmatprep.mubr.msk.f32.mxu0 %vm2249_vm0, %v2248_v0  ;;  %v733_v2 = vld [vmem:[#allocation4 + $0x70] sm:$0xff]  ;;  %v732_v3 = vld [vmem:[#allocation4 + $0x68] sm:$0xff]  ;;  %s2669_s2 = sld [smem:[#allocation19_spill]]  ;;  %vm713_vm1 = vcmask 31744  }
  0x73   : > { %s2672_s28 = smov (!%p691_p3, %s2351_s28), 1  ;;  %1769 = vmatprep.subr.mxu1 %v2248_v0  ;;  %1801 = vmatprep.mubr.msk.f32.mxu1 %vm2249_vm0, %v2248_v0  ;;  %v731_v4 = vld [vmem:[#allocation4 + $0x60] sm:$0xff]  ;;  %v828_v6 = vld [vmem:[#allocation6 + $0x78] sm:$0xff]  ;;  %v827_v8 = vld [vmem:[#allocation6 + $0x70] sm:$0xff]  ;;  %s2670_s30 = sld [smem:[#allocation20_spill]] }
  0x74   : > { %s2479_s4 = sshll.u32 %s2672_s28, 3  ;;  %1735 = vmatpush3.msra.mxu0 %v734_v1  ;;  %v730_v7 = vld [vmem:[#allocation4 + $0x58] sm:$0xff]  ;;  %1770 = vmatpush3.msra.mxu1 %v828_v6  ;;  %v826_v9 = vld [vmem:[#allocation6 + $0x68] sm:$0xff]  ;;  %v729_v10 = vld [vmem:[#allocation4 + $0x50] sm:$0xff] }
  0x75   : > { %1736 = vmatprep.subr.mxu0 %v2248_v0  ;;  %1771 = vmatprep.subr.mxu1 %v2248_v0  ;;  %v825_v11 = vld [vmem:[#allocation6 + $0x60] sm:$0xff]  ;;  %v728_v12 = vld [vmem:[#allocation4 + $0x48] sm:$0xff]  ;;  %v824_v13 = vld [vmem:[#allocation6 + $0x58] sm:$0xff]  ;;  %s710_s21 = scalar_lea.vmem %s2651_s18, %s2479_s4  ;;  %s702_s29 = scalar_lea.vmem %s2649_s16, %s2479_s4 }
  0x76   : > { %1737 = vmatpush3.msra.mxu0 %v733_v2  ;;  %1772 = vmatpush3.msra.mxu1 %v827_v8  ;;  %v727_v14 = vld [vmem:[#allocation4 + $0x40] sm:$0xff]  ;;  %v823_v15 = vld [vmem:[#allocation6 + $0x50] sm:$0xff]  ;;  %v726_v16 = vld [vmem:[#allocation4 + $0x38] sm:$0xff] }
  0x77   : > { %1738 = vmatprep.subr.mxu0 %v2248_v0  ;;  %1773 = vmatprep.subr.mxu1 %v2248_v0  ;;  %v822_v17 = vld [vmem:[#allocation6 + $0x48] sm:$0xff]  ;;  %v725_v18 = vld [vmem:[#allocation4 + $0x30] sm:$0xff]  ;;  %v821_v19 = vld [vmem:[#allocation6 + $0x40] sm:$0xff] }
  0x78   : > { %s694_s19 = scalar_lea.vmem %s2669_s2, %s2479_s4  ;;  %1739 = vmatpush3.msra.mxu0 %v732_v3  ;;  %1774 = vmatpush3.msra.mxu1 %v826_v9  ;;  %v724_v20 = vld [vmem:[#allocation4 + $0x28] sm:$0xff]  ;;  %v820_v21 = vld [vmem:[#allocation6 + $0x38] sm:$0xff]  ;;  %v723_v22 = vld [vmem:[#allocation4 + $0x20] sm:$0xff] }
  0x79   : > { %v712_v5 = vld [vmem:[%s694_s19] sm:$0xff]  ;;  %1740 = vmatprep.subr.mxu0 %v2248_v0  ;;  %1775 = vmatprep.subr.mxu1 %v2248_v0  ;;  %v722_v24 = vld [vmem:[#allocation4 + $0x18] sm:$0xff]  ;;  %v818_v25 = vld [vmem:[#allocation6 + $0x28] sm:$0xff]  ;;  %s698_s26 = scalar_lea.vmem %s2670_s30, %s2479_s4  ;;  %s706_s19 = scalar_lea.vmem %s2650_s17, %s2479_s4 }
  0x7a   : > { %714 = vst.msk [vmem:[#allocation2] sm:$0xff] %vm713_vm1, %v712_v5  ;;  %1741 = vmatpush3.msra.mxu0 %v731_v4  ;;  %1776 = vmatpush3.msra.mxu1 %v825_v11  ;;  %v819_v23 = vld [vmem:[#allocation6 + $0x30] sm:$0xff]  ;;  %v817_v27 = vld [vmem:[#allocation6 + $0x20] sm:$0xff]  ;;  %v720_v28 = vld [vmem:[#allocation4 + $0x8] sm:$0xff] }
  0x7b   : > { %1742 = vmatprep.subr.mxu0 %v2248_v0  ;;  %1777 = vmatprep.subr.mxu1 %v2248_v0  ;;  %v721_v26 = vld [vmem:[#allocation4 + $0x10] sm:$0xff]  ;;  %v816_v29 = vld [vmem:[#allocation6 + $0x18] sm:$0xff]  ;;  %v719_v30 = vld [vmem:[#allocation4] sm:$0xff] }
  0x7c   : > { %1743 = vmatpush3.msra.mxu0 %v730_v7  ;;  %1778 = vmatpush3.msra.mxu1 %v824_v13  ;;  %v815_v32 = vld [vmem:[#allocation6 + $0x10] sm:$0xff]  ;;  %v814_v33 = vld [vmem:[#allocation6 + $0x8] sm:$0xff]  ;;  %v813_v34 = vld [vmem:[#allocation6] sm:$0xff] }
  0x7d   : > { %1744 = vmatprep.subr.mxu0 %v2248_v0  ;;  %1779 = vmatprep.subr.mxu1 %v2248_v0  ;;  %v922_v35 = vld [vmem:[#allocation8 + $0x78] sm:$0xff]  ;;  %v921_v36 = vld [vmem:[#allocation8 + $0x70] sm:$0xff]  ;;  %v920_v37 = vld [vmem:[#allocation8 + $0x68] sm:$0xff] }
  0x7e   : > { %1745 = vmatpush3.msra.mxu0 %v729_v10  ;;  %1780 = vmatpush3.msra.mxu1 %v823_v15  ;;  %v919_v38 = vld [vmem:[#allocation8 + $0x60] sm:$0xff]  ;;  %v918_v39 = vld [vmem:[#allocation8 + $0x58] sm:$0xff]  ;;  %v917_v40 = vld [vmem:[#allocation8 + $0x50] sm:$0xff] }
  0x7f   : > { %1746 = vmatprep.subr.mxu0 %v2248_v0  ;;  %1781 = vmatprep.subr.mxu1 %v2248_v0  ;;  %v916_v41 = vld [vmem:[#allocation8 + $0x48] sm:$0xff]  ;;  %v915_v42 = vld [vmem:[#allocation8 + $0x40] sm:$0xff]  ;;  %v914_v43 = vld [vmem:[#allocation8 + $0x38] sm:$0xff] }
  0x80   : > { %1747 = vmatpush3.msra.mxu0 %v728_v12  ;;  %1782 = vmatpush3.msra.mxu1 %v822_v17  ;;  %v913_v44 = vld [vmem:[#allocation8 + $0x30] sm:$0xff]  ;;  %v912_v45 = vld [vmem:[#allocation8 + $0x28] sm:$0xff]  ;;  %v911_v46 = vld [vmem:[#allocation8 + $0x20] sm:$0xff] }
  0x81   : > { %1748 = vmatprep.subr.mxu0 %v2248_v0  ;;  %1783 = vmatprep.subr.mxu1 %v2248_v0  ;;  %v718_v31 = vld [vmem:[#allocation2] sm:$0xff]  ;;  %v910_v47 = vld [vmem:[#allocation8 + $0x18] sm:$0xff]  ;;  %v908_v54 = vld [vmem:[#allocation8 + $0x8] sm:$0xff] }
  0x82   : > { %1749 = vmatpush3.msra.mxu0 %v727_v14  ;;  %1784 = vmatpush3.msra.mxu1 %v821_v19  ;;  %v1624_v48 = vld [vmem:[%s2636_s3] ss:$0 sm:$0xff]  ;;  %v907_v55 = vld [vmem:[#allocation8] sm:$0xff]  ;;  %v1031_v56 = vld [vmem:[#allocation9 + $0xf8] sm:$0xff] }
  0x83   : > { %1750 = vmatprep.subr.mxu0 %v2248_v0  ;;  %1785 = vmatprep.subr.mxu1 %v2248_v0  ;;  %v909_v53 = vld [vmem:[#allocation8 + $0x10] sm:$0xff]  ;;  %v1029_v58 = vld [vmem:[#allocation9 + $0xe8] sm:$0xff]  ;;  %v1028_v59 = vld [vmem:[#allocation9 + $0xe0] sm:$0xff] }
  0x84   : > { %1751 = vmatpush3.msra.mxu0 %v726_v16  ;;  %1786 = vmatpush3.msra.mxu1 %v820_v21  ;;  %v1030_v57 = vld [vmem:[#allocation9 + $0xf0] sm:$0xff]  ;;  %v1027_v60 = vld [vmem:[#allocation9 + $0xd8] sm:$0xff]  ;;  %v1025_v62 = vld [vmem:[#allocation9 + $0xc8] sm:$0xff] }
  0x85   : > { %1752 = vmatprep.subr.mxu0 %v2248_v0  ;;  %1787 = vmatprep.subr.mxu1 %v2248_v0  ;;  %v1026_v61 = vld [vmem:[#allocation9 + $0xd0] sm:$0xff]  ;;  %v1024_v63 = vld [vmem:[#allocation9 + $0xc0] sm:$0xff]  ;;  %v1023_v1 = vld [vmem:[#allocation9 + $0xb8] sm:$0xff] }
  0x86   : > { %1753 = vmatpush3.msra.mxu0 %v725_v18  ;;  %1788 = vmatpush3.msra.mxu1 %v819_v23  ;;  %v1022_v2 = vld [vmem:[#allocation9 + $0xb0] sm:$0xff]  ;;  %v1021_v3 = vld [vmem:[#allocation9 + $0xa8] sm:$0xff]  ;;  %v1020_v4 = vld [vmem:[#allocation9 + $0xa0] sm:$0xff] }
  0x87   : > { %1754 = vmatprep.subr.mxu0 %v2248_v0  ;;  %1789 = vmatprep.subr.mxu1 %v2248_v0  ;;  %v1019_v5 = vld [vmem:[#allocation9 + $0x98] sm:$0xff]  ;;  %v1018_v6 = vld [vmem:[#allocation9 + $0x90] sm:$0xff]  ;;  %v1017_v7 = vld [vmem:[#allocation9 + $0x88] sm:$0xff] }
  0x88   : > { %1755 = vmatpush3.msra.mxu0 %v724_v20  ;;  %1790 = vmatpush3.msra.mxu1 %v818_v25  ;;  %v1016_v8 = vld [vmem:[#allocation9 + $0x80] sm:$0xff]  ;;  %v1015_v9 = vld [vmem:[#allocation9 + $0x78] sm:$0xff]  ;;  %v1014_v10 = vld [vmem:[#allocation9 + $0x70] sm:$0xff] }
  0x89   : > { %1756 = vmatprep.subr.mxu0 %v2248_v0  ;;  %1791 = vmatprep.subr.mxu1 %v2248_v0  ;;  %v1013_v11 = vld [vmem:[#allocation9 + $0x68] sm:$0xff]  ;;  %v1012_v12 = vld [vmem:[#allocation9 + $0x60] sm:$0xff]  ;;  %v1011_v13 = vld [vmem:[#allocation9 + $0x58] sm:$0xff] }
  0x8a   : > { %1757 = vmatpush3.msra.mxu0 %v723_v22  ;;  %1792 = vmatpush3.msra.mxu1 %v817_v27  ;;  %v1010_v14 = vld [vmem:[#allocation9 + $0x50] sm:$0xff]  ;;  %v1009_v15 = vld [vmem:[#allocation9 + $0x48] sm:$0xff]  ;;  %v1008_v16 = vld [vmem:[#allocation9 + $0x40] sm:$0xff] }
  0x8b   : > { %1758 = vmatprep.subr.mxu0 %v2248_v0  ;;  %1793 = vmatprep.subr.mxu1 %v2248_v0  ;;  %v1007_v17 = vld [vmem:[#allocation9 + $0x38] sm:$0xff]  ;;  %v1006_v18 = vld [vmem:[#allocation9 + $0x30] sm:$0xff]  ;;  %v1005_v19 = vld [vmem:[#allocation9 + $0x28] sm:$0xff] }
  0x8c   : > { %1759 = vmatpush3.msra.mxu0 %v722_v24  ;;  %1794 = vmatpush3.msra.mxu1 %v816_v29  ;;  %v1004_v20 = vld [vmem:[#allocation9 + $0x20] sm:$0xff]  ;;  %v1003_v21 = vld [vmem:[#allocation9 + $0x18] sm:$0xff]  ;;  %v1625_v22 = vld [vmem:[%s2638_s5] ss:$0 sm:$0xff] }
  0x8d   : > { %1760 = vmatprep.subr.mxu0 %v2248_v0  ;;  %1795 = vmatprep.subr.mxu1 %v2248_v0  ;;  %v1002_v27 = vld [vmem:[#allocation9 + $0x10] sm:$0xff]  ;;  %v1000_v29 = vld [vmem:[#allocation9] sm:$0xff] }
  0x8e   : > { %1761 = vmatpush3.msra.mxu0 %v721_v26  ;;  %1796 = vmatpush3.msra.mxu1 %v815_v32  ;;  %v1133_v32 = vld [vmem:[#allocation11 + $0x68] sm:$0xff] }
  0x8f   : > { %1762 = vmatprep.subr.mxu0 %v2248_v0  ;;  %1797 = vmatprep.subr.mxu1 %v2248_v0 }
  0x90   : > { %1763 = vmatpush3.msra.mxu0 %v720_v28  ;;  %1798 = vmatpush3.msra.mxu1 %v814_v33  ;;  %v1001_v28 = vld [vmem:[#allocation9 + $0x8] sm:$0xff]  ;;  %v1626_v33 = vld [vmem:[%s2640_s7] ss:$0 sm:$0xff] }
  0x91   : > { %1764 = vmatprep.subr.mxu0 %v2248_v0  ;;  %1799 = vmatprep.subr.mxu1 %v2248_v0 }
  0x92   : > { %1765 = vmatpush3.msra.mxu0 %v719_v30  ;;  %1800 = vmatpush3.msra.mxu1 %v813_v34  ;;  %v1135_v30 = vld [vmem:[#allocation11 + $0x78] sm:$0xff] }
  0x93   : > { %1767 = vmatmul.mubr.f32.vlgmr.msra.gmra.mxu0 %v718_v31  ;;  %1804 = vmatprep.subr.mxu0 %v2248_v0  ;;  %v1134_v31 = vld [vmem:[#allocation11 + $0x70] sm:$0xff] }
  0x94   : > { %1836 = vmatprep.mubr.msk.f32.mxu0 %vm2249_vm0, %v2248_v0  ;;  %1805 = vmatpush3.msra.mxu0 %v922_v35 }
  0x95   : > { %1806 = vmatprep.subr.mxu0 %v2248_v0  ;;  %1044 = vmatprep.subr.mxu1 %v1031_v56  ;;  %v1224_v56 = vld [vmem:[#allocation12 + $0x50] sm:$0xff] }
  0x96   : > { %1807 = vmatpush3.msra.mxu0 %v921_v36 }
  0x97   : > { %1808 = vmatprep.subr.mxu0 %v2248_v0 }
  0x98   : > { %1809 = vmatpush3.msra.mxu0 %v920_v37  ;;  %v1132_v37 = vld [vmem:[#allocation11 + $0x60] sm:$0xff] }
  0x99   : > { %1810 = vmatprep.subr.mxu0 %v2248_v0 }
  0x9a   : > { %1811 = vmatpush3.msra.mxu0 %v919_v38  ;;  %v1131_v38 = vld [vmem:[#allocation11 + $0x58] sm:$0xff] }
  0x9b   : > { %1812 = vmatprep.subr.mxu0 %v2248_v0 }
  0x9c   : > { %1813 = vmatpush3.msra.mxu0 %v918_v39  ;;  %v1130_v39 = vld [vmem:[#allocation11 + $0x50] sm:$0xff] }
  0x9d   : > { %1814 = vmatprep.subr.mxu0 %v2248_v0 }
  0x9e   : > { %1815 = vmatpush3.msra.mxu0 %v917_v40  ;;  %v1129_v40 = vld [vmem:[#allocation11 + $0x48] sm:$0xff] }
  0x9f   : > { %1816 = vmatprep.subr.mxu0 %v2248_v0 }
  0xa0   : > { %1817 = vmatpush3.msra.mxu0 %v916_v41  ;;  %v1128_v41 = vld [vmem:[#allocation11 + $0x40] sm:$0xff] }
  0xa1   : > { %1818 = vmatprep.subr.mxu0 %v2248_v0 }
  0xa2   : > { %1819 = vmatpush3.msra.mxu0 %v915_v42  ;;  %v1127_v42 = vld [vmem:[#allocation11 + $0x38] sm:$0xff] }
  0xa3   : > { %1820 = vmatprep.subr.mxu0 %v2248_v0 }
  0xa4   : > { %1821 = vmatpush3.msra.mxu0 %v914_v43  ;;  %v1126_v43 = vld [vmem:[#allocation11 + $0x30] sm:$0xff] }
  0xa5   : > { %1822 = vmatprep.subr.mxu0 %v2248_v0 }
  0xa6   : > { %1823 = vmatpush3.msra.mxu0 %v913_v44  ;;  %v716_v44 = vld [vmem:[%s698_s26] sm:$0xff] }
  0xa7   : > { %1824 = vmatprep.subr.mxu0 %v2248_v0  ;;  %717 = vst.msk [vmem:[#allocation3] sm:$0xff] %vm713_vm1, %v716_v44 }
  0xa8   : > { %1825 = vmatpush3.msra.mxu0 %v912_v45  ;;  %v1125_v45 = vld [vmem:[#allocation11 + $0x28] sm:$0xff] }
  0xa9   : > { %1826 = vmatprep.subr.mxu0 %v2248_v0 }
  0xaa   : > { %1827 = vmatpush3.msra.mxu0 %v911_v46  ;;  %v1124_v46 = vld [vmem:[#allocation11 + $0x20] sm:$0xff] }
  0xab   : > { %1828 = vmatprep.subr.mxu0 %v2248_v0 }
  0xac   : > { %1829 = vmatpush3.msra.mxu0 %v910_v47  ;;  %v1123_v47 = vld [vmem:[#allocation11 + $0x18] sm:$0xff] }
  0xad   : > { %1830 = vmatprep.subr.mxu0 %v2248_v0 }
  0xae   : > { %1831 = vmatpush3.msra.mxu0 %v909_v53  ;;  %v1227_v53 = vld [vmem:[#allocation12 + $0x68] sm:$0xff] }
  0xaf   : > { %1832 = vmatprep.subr.mxu0 %v2248_v0 }
  0xb0   : > { %1833 = vmatpush3.msra.mxu0 %v908_v54  ;;  %v1226_v54 = vld [vmem:[#allocation12 + $0x60] sm:$0xff] }
  0xb1   : > { %1834 = vmatprep.subr.mxu0 %v2248_v0 }
  0xb2   : > { %1835 = vmatpush3.msra.mxu0 %v907_v55  ;;  %v1225_v55 = vld [vmem:[#allocation12 + $0x58] sm:$0xff] }
  0xb3   : > { %1839 = vmatprep.subr.mxu0 %v2248_v0 }
 0x153   : > { %v808_v49 = vpop.f32.mrf.mxu0 }
 0x154   : > { %v809_v50 = vadd.f32 %v1624_v48, %v808_v49  ;;  %v1122_v48 = vld [vmem:[#allocation11 + $0x10] sm:$0xff]  ;;  %v1121_v49 = vld [vmem:[#allocation11 + $0x8] sm:$0xff] }
 0x155   : > { %v1768_v51 = vpop.f32.mrf.mxu0 }
 0x156   : > { %v812_v52 = vmax.f32 %v809_v50, 0.0  ;;  %v1120_v50 = vld [vmem:[#allocation11] sm:$0xff]  ;;  %v1229_v51 = vld [vmem:[#allocation12 + $0x78] sm:$0xff] }
 0x158   : > { %1802 = vmatmul.mubr.f32.vlgmr.msra.gmra.mxu1 %v812_v52  ;;  %v1228_v52 = vld [vmem:[#allocation12 + $0x70] sm:$0xff] }
 0x159   : > { %1108 = vmatprep.mubr.f32.mxu1 %v2248_v0  ;;  %1045 = vmatpush1.msra.mxu1 %v1030_v57  ;;  %v1223_v57 = vld [vmem:[#allocation12 + $0x48] sm:$0xff] }
 0x15a   : > { %1046 = vmatprep.subr.mxu1 %v1029_v58  ;;  %v1222_v58 = vld [vmem:[#allocation12 + $0x40] sm:$0xff] }
 0x15b   : > { %1047 = vmatpush1.msra.mxu1 %v1028_v59  ;;  %v1221_v59 = vld [vmem:[#allocation12 + $0x38] sm:$0xff] }
 0x15c   : > { %1048 = vmatprep.subr.mxu1 %v1027_v60  ;;  %v1220_v60 = vld [vmem:[#allocation12 + $0x30] sm:$0xff] }
 0x15d   : > { %1049 = vmatpush1.msra.mxu1 %v1026_v61  ;;  %v1219_v61 = vld [vmem:[#allocation12 + $0x28] sm:$0xff] }
 0x15e   : > { %1050 = vmatprep.subr.mxu1 %v1025_v62  ;;  %v1218_v62 = vld [vmem:[#allocation12 + $0x20] sm:$0xff] }
 0x15f   : > { %1051 = vmatpush1.msra.mxu1 %v1024_v63  ;;  %v1217_v63 = vld [vmem:[#allocation12 + $0x18] sm:$0xff] }
 0x160   : > { %1052 = vmatprep.subr.mxu1 %v1023_v1  ;;  %v1034_v1 = vlaneseq }
 0x161   : > { %1053 = vmatpush1.msra.mxu1 %v1022_v2 }
 0x162   : > { %1054 = vmatprep.subr.mxu1 %v1021_v3  ;;  %v1035_v2 = vshrl.u32 %v1034_v1, 7 }
 0x163   : > { %1055 = vmatpush1.msra.mxu1 %v1020_v4  ;;  %v1032_v4 = vld [vmem:[%s2642_s9] sm:$0x3] }
 0x164   : > { %1056 = vmatprep.subr.mxu1 %v1019_v5  ;;  %v1036_v3 = vsub.s32 0, %v1035_v2  ;;  %v1040_v5 = vsub.s32 1, %v1035_v2 }
 0x165   : > { %1057 = vmatpush1.msra.mxu1 %v1018_v6 }
 0x166   : > { %1058 = vmatprep.subr.mxu1 %v1017_v7  ;;  %v1037_v6 = vrot.slane %v1032_v4, %v1036_v3  ;;  %v1041_v7 = vrot.slane %v1032_v4, %v1040_v5 }
 0x167   : > { %1059 = vmatpush1.msra.mxu1 %v1016_v8 }
 0x168   : > { %1060 = vmatprep.subr.mxu1 %v1015_v9 }
 0x169   : > { %1061 = vmatpush1.msra.mxu1 %v1014_v10 }
 0x16a   : > { %1062 = vmatprep.subr.mxu1 %v1013_v11 }
 0x16b   : > { %1063 = vmatpush1.msra.mxu1 %v1012_v12 }
 0x16c   : > { %1064 = vmatprep.subr.mxu1 %v1011_v13  ;;  %v1117_v13 = vld [vmem:[#allocation3] sm:$0xff] }
 0x16d   : > { %1065 = vmatpush1.msra.mxu1 %v1010_v14 }
 0x16e   : > { %1066 = vmatprep.subr.mxu1 %v1009_v15 }
 0x16f   : > { %1067 = vmatpush1.msra.mxu1 %v1008_v16 }
 0x170   : > { %1068 = vmatprep.subr.mxu1 %v1007_v17  ;;  %v1216_v17 = vld [vmem:[#allocation12 + $0x10] sm:$0xff] }
 0x171   : > { %1069 = vmatpush1.msra.mxu1 %v1006_v18  ;;  %v1215_v18 = vld [vmem:[#allocation12 + $0x8] sm:$0xff] }
 0x172   : > { %1070 = vmatprep.subr.mxu1 %v1005_v19  ;;  %v1214_v19 = vld [vmem:[#allocation12] sm:$0xff] }
 0x173   : > { %1071 = vmatpush1.msra.mxu1 %v1004_v20  ;;  %v1323_v20 = vld [vmem:[#allocation14 + $0x78] sm:$0xff] }
 0x174   : > { %1072 = vmatprep.subr.mxu1 %v1003_v21  ;;  %v1322_v21 = vld [vmem:[#allocation14 + $0x70] sm:$0xff] }
 0x175   : > { %1073 = vmatpush1.msra.mxu1 %v1002_v27  ;;  %v1316_v27 = vld [vmem:[#allocation14 + $0x40] sm:$0xff] }
 0x176   : > { %1074 = vmatprep.subr.mxu1 %v1001_v28  ;;  %v1315_v28 = vld [vmem:[#allocation14 + $0x38] sm:$0xff] }
 0x177   : > { %1075 = vmatpush1.msra.mxu1 %v1000_v29  ;;  %v1314_v29 = vld [vmem:[#allocation14 + $0x30] sm:$0xff] }
 0x178   : > { %1874 = vmatprep.subr.mxu1 %v2248_v0 }
 0x218   : > { %v902_v23 = vpop.f32.mrf.mxu1 }
 0x219   : > { %v903_v24 = vadd.f32 %v1625_v22, %v902_v23  ;;  %v1321_v22 = vld [vmem:[#allocation14 + $0x68] sm:$0xff]  ;;  %v1320_v23 = vld [vmem:[#allocation14 + $0x60] sm:$0xff] }
 0x21a   : > { %v1803_v25 = vpop.f32.mrf.mxu1 }
 0x21b   : > { %v906_v26 = vmax.f32 %v903_v24, 0.0  ;;  %v1319_v24 = vld [vmem:[#allocation14 + $0x58] sm:$0xff]  ;;  %v1318_v25 = vld [vmem:[#allocation14 + $0x50] sm:$0xff] }
 0x21d   : > { %1837 = vmatmul.mubr.f32.vlgmr.msra.gmra.mxu0 %v906_v26  ;;  %v1317_v26 = vld [vmem:[#allocation14 + $0x48] sm:$0xff] }
 0x21e   : > { %1871 = vmatprep.mubr.msk.f32.mxu0 %vm2249_vm0, %v2248_v0  ;;  %1840 = vmatpush3.msra.mxu0 %v1135_v30  ;;  %v1313_v30 = vld [vmem:[#allocation14 + $0x28] sm:$0xff] }
 0x21f   : > { %1841 = vmatprep.subr.mxu0 %v2248_v0 }
 0x220   : > { %1842 = vmatpush3.msra.mxu0 %v1134_v31  ;;  %v1312_v31 = vld [vmem:[#allocation14 + $0x20] sm:$0xff] }
 0x221   : > { %1843 = vmatprep.subr.mxu0 %v2248_v0 }
 0x222   : > { %1844 = vmatpush3.msra.mxu0 %v1133_v32  ;;  %v1311_v32 = vld [vmem:[#allocation14 + $0x18] sm:$0xff] }
 0x223   : > { %1845 = vmatprep.subr.mxu0 %v2248_v0 }
 0x224   : > { %1846 = vmatpush3.msra.mxu0 %v1132_v37 }
 0x225   : > { %1847 = vmatprep.subr.mxu0 %v2248_v0 }
 0x226   : > { %1848 = vmatpush3.msra.mxu0 %v1131_v38  ;;  %v1310_v38 = vld [vmem:[#allocation14 + $0x10] sm:$0xff] }
 0x227   : > { %1849 = vmatprep.subr.mxu0 %v2248_v0 }
 0x228   : > { %1850 = vmatpush3.msra.mxu0 %v1130_v39  ;;  %v1309_v39 = vld [vmem:[#allocation14 + $0x8] sm:$0xff] }
 0x229   : > { %1851 = vmatprep.subr.mxu0 %v2248_v0 }
 0x22a   : > { %1852 = vmatpush3.msra.mxu0 %v1129_v40  ;;  %v1308_v40 = vld [vmem:[#allocation14] sm:$0xff] }
 0x22b   : > { %1853 = vmatprep.subr.mxu0 %v2248_v0 }
 0x22c   : > { %1854 = vmatpush3.msra.mxu0 %v1128_v41  ;;  %v1628_v41 = vld [vmem:[%s2646_s13] ss:$0 sm:$0xff] }
 0x22d   : > { %1855 = vmatprep.subr.mxu0 %v2248_v0 }
 0x22e   : > { %1856 = vmatpush3.msra.mxu0 %v1127_v42 }
 0x22f   : > { %1857 = vmatprep.subr.mxu0 %v2248_v0 }
 0x230   : > { %1858 = vmatpush3.msra.mxu0 %v1126_v43 }
 0x231   : > { %1859 = vmatprep.subr.mxu0 %v2248_v0 }
 0x232   : > { %1860 = vmatpush3.msra.mxu0 %v1125_v45 }
 0x233   : > { %1861 = vmatprep.subr.mxu0 %v2248_v0 }
 0x234   : > { %1862 = vmatpush3.msra.mxu0 %v1124_v46  ;;  %v1629_v46 = vld [vmem:[%s2648_s15] ss:$0 sm:$0xff] }
 0x235   : > { %1863 = vmatprep.subr.mxu0 %v2248_v0 }
 0x236   : > { %1864 = vmatpush3.msra.mxu0 %v1123_v47 }
 0x237   : > { %1865 = vmatprep.subr.mxu0 %v2248_v0 }
 0x238   : > { %1866 = vmatpush3.msra.mxu0 %v1122_v48 }
 0x239   : > { %1867 = vmatprep.subr.mxu0 %v2248_v0 }
 0x23a   : > { %1868 = vmatpush3.msra.mxu0 %v1121_v49 }
 0x23b   : > { %1869 = vmatprep.subr.mxu0 %v2248_v0 }
 0x23c   : > { %1870 = vmatpush3.msra.mxu0 %v1120_v50 }
 0x23d   : > { %1909 = vmatprep.subr.mxu0 %v2248_v0 }
 0x2dd   : > { %v996_v34 = vpop.f32.mrf.mxu0 }
 0x2de   : > { %v997_v35 = vadd.f32 %v1626_v33, %v996_v34  ;;  %v1627_v33 = vld [vmem:[%s2644_s11] ss:$0 sm:$0xff] }
 0x2df   : > { %v1838_v36 = vpop.f32.mrf.mxu0 }
 0x2e0   : > { %1109 = vmatmul.mubr.f32.vlgmr.msra.gmra.mxu1 %v997_v35 }
 0x2e1   : > { %1906 = vmatprep.mubr.msk.f32.mxu1 %vm2249_vm0, %v2248_v0  ;;  %1875 = vmatpush3.msra.mxu1 %v1229_v51 }
 0x2e2   : > { %1876 = vmatprep.subr.mxu1 %v2248_v0 }
 0x2e3   : > { %1877 = vmatpush3.msra.mxu1 %v1228_v52 }
 0x2e4   : > { %1878 = vmatprep.subr.mxu1 %v2248_v0 }
 0x2e5   : > { %1879 = vmatpush3.msra.mxu1 %v1227_v53 }
 0x2e6   : > { %1880 = vmatprep.subr.mxu1 %v2248_v0 }
 0x2e7   : > { %1881 = vmatpush3.msra.mxu1 %v1226_v54 }
 0x2e8   : > { %1882 = vmatprep.subr.mxu1 %v2248_v0 }
 0x2e9   : > { %1883 = vmatpush3.msra.mxu1 %v1225_v55 }
 0x2ea   : > { %1884 = vmatprep.subr.mxu1 %v2248_v0 }
 0x2eb   : > { %1885 = vmatpush3.msra.mxu1 %v1224_v56 }
 0x2ec   : > { %1886 = vmatprep.subr.mxu1 %v2248_v0 }
 0x2ed   : > { %1887 = vmatpush3.msra.mxu1 %v1223_v57 }
 0x2ee   : > { %1888 = vmatprep.subr.mxu1 %v2248_v0 }
 0x2ef   : > { %1889 = vmatpush3.msra.mxu1 %v1222_v58 }
 0x2f0   : > { %1890 = vmatprep.subr.mxu1 %v2248_v0 }
 0x2f1   : > { %1891 = vmatpush3.msra.mxu1 %v1221_v59 }
 0x2f2   : > { %1892 = vmatprep.subr.mxu1 %v2248_v0 }
 0x2f3   : > { %1893 = vmatpush3.msra.mxu1 %v1220_v60 }
 0x2f4   : > { %1894 = vmatprep.subr.mxu1 %v2248_v0 }
 0x2f5   : > { %1895 = vmatpush3.msra.mxu1 %v1219_v61 }
 0x2f6   : > { %1896 = vmatprep.subr.mxu1 %v2248_v0 }
 0x2f7   : > { %1897 = vmatpush3.msra.mxu1 %v1218_v62 }
 0x2f8   : > { %1898 = vmatprep.subr.mxu1 %v2248_v0 }
 0x2f9   : > { %1899 = vmatpush3.msra.mxu1 %v1217_v63 }
 0x2fa   : > { %1900 = vmatprep.subr.mxu1 %v2248_v0 }
 0x2fb   : > { %1901 = vmatpush3.msra.mxu1 %v1216_v17 }
 0x2fc   : > { %1902 = vmatprep.subr.mxu1 %v2248_v0 }
 0x2fd   : > { %1903 = vmatpush3.msra.mxu1 %v1215_v18 }
 0x2fe   : > { %1904 = vmatprep.subr.mxu1 %v2248_v0 }
 0x2ff   : > { %1905 = vmatpush3.msra.mxu1 %v1214_v19 }
 0x3a0   : > { %v1110_v8 = vpop.f32.mrf.mxu1 }
 0x3a1   : > { %v1111_v9 = vadd.f32 %v1110_v8, %v1037_v6 }
 0x3a2   : > { %v1112_v10 = vpop.f32.mrf.mxu1 }
 0x3a3   : > { %1402 = vst.msk [vmem:[%s706_s19] sm:$0xff] %vm713_vm1, %v1111_v9  ;;  %v1113_v11 = vadd.f32 %v1112_v10, %v1041_v7 }
 0x3a5   : > { %v1115_v12 = vmul.f32 1.442695, %v1113_v11 }
 0x3a7   : > { %2029 = vpow2.f32 %v1115_v12 }
 0x3b4   : > { %v2030_v14 = vpop.eup %2029 }
 0x3b5   : > { %1403 = vst.msk [vmem:[%s710_s21] sm:$0xff] %vm713_vm1, %v2030_v14  ;;  %v1118_v15 = vmul.f32 %v2030_v14, %v1117_v13 }
 0x3b7   : > { %v1119_v16 = vadd.f32 %v1118_v15, %v1111_v9 }
 0x3b9   : > { %1872 = vmatmul.mubr.f32.vlgmr.msra.gmra.mxu0 %v1119_v16 }
 0x3ba   : > { %1941 = vmatprep.mubr.msk.f32.mxu0 %vm2249_vm0, %v2248_v0  ;;  %1910 = vmatpush3.msra.mxu0 %v1323_v20 }
 0x3bb   : > { %1911 = vmatprep.subr.mxu0 %v2248_v0 }
 0x3bc   : > { %1912 = vmatpush3.msra.mxu0 %v1322_v21 }
 0x3bd   : > { %1913 = vmatprep.subr.mxu0 %v2248_v0 }
 0x3be   : > { %1914 = vmatpush3.msra.mxu0 %v1321_v22 }
 0x3bf   : > { %1915 = vmatprep.subr.mxu0 %v2248_v0 }
 0x3c0   : > { %1916 = vmatpush3.msra.mxu0 %v1320_v23 }
 0x3c1   : > { %1917 = vmatprep.subr.mxu0 %v2248_v0 }
 0x3c2   : > { %1918 = vmatpush3.msra.mxu0 %v1319_v24 }
 0x3c3   : > { %1919 = vmatprep.subr.mxu0 %v2248_v0 }
 0x3c4   : > { %1920 = vmatpush3.msra.mxu0 %v1318_v25 }
 0x3c5   : > { %1921 = vmatprep.subr.mxu0 %v2248_v0 }
 0x3c6   : > { %1922 = vmatpush3.msra.mxu0 %v1317_v26 }
 0x3c7   : > { %1923 = vmatprep.subr.mxu0 %v2248_v0 }
 0x3c8   : > { %1924 = vmatpush3.msra.mxu0 %v1316_v27 }
 0x3c9   : > { %1925 = vmatprep.subr.mxu0 %v2248_v0 }
 0x3ca   : > { %1926 = vmatpush3.msra.mxu0 %v1315_v28 }
 0x3cb   : > { %1927 = vmatprep.subr.mxu0 %v2248_v0 }
 0x3cc   : > { %1928 = vmatpush3.msra.mxu0 %v1314_v29 }
 0x3cd   : > { %1929 = vmatprep.subr.mxu0 %v2248_v0 }
 0x3ce   : > { %1930 = vmatpush3.msra.mxu0 %v1313_v30 }
 0x3cf   : > { %1931 = vmatprep.subr.mxu0 %v2248_v0 }
 0x3d0   : > { %1932 = vmatpush3.msra.mxu0 %v1312_v31 }
 0x3d1   : > { %1933 = vmatprep.subr.mxu0 %v2248_v0 }
 0x3d2   : > { %1934 = vmatpush3.msra.mxu0 %v1311_v32 }
 0x3d3   : > { %1935 = vmatprep.subr.mxu0 %v2248_v0 }
 0x3d4   : > { %1936 = vmatpush3.msra.mxu0 %v1310_v38 }
 0x3d5   : > { %1937 = vmatprep.subr.mxu0 %v2248_v0 }
 0x3d6   : > { %1938 = vmatpush3.msra.mxu0 %v1309_v39 }
 0x3d7   : > { %1939 = vmatprep.subr.mxu0 %v2248_v0 }
 0x3d8   : > { %1940 = vmatpush3.msra.mxu0 %v1308_v40 }
 0x479   : > { %v1209_v34 = vpop.f32.mrf.mxu0 }
 0x47a   : > { %v1210_v35 = vadd.f32 %v1627_v33, %v1209_v34 }
 0x47b   : > { %v1873_v36 = vpop.f32.mrf.mxu0 }
 0x47c   : > { %v1213_v37 = vmax.f32 %v1210_v35, 0.0 }
 0x47e   : > { %1907 = vmatmul.mubr.f32.vlgmr.msra.gmra.mxu1 %v1213_v37 }
 0x53e   : > { %v1303_v42 = vpop.f32.mrf.mxu1 }
 0x53f   : > { %v1304_v43 = vadd.f32 %v1628_v41, %v1303_v42 }
 0x540   : > { %v1908_v44 = vpop.f32.mrf.mxu1 }
 0x541   : > { %v1307_v45 = vmax.f32 %v1304_v43, 0.0 }
 0x543   : > { %1942 = vmatmul.mubr.f32.vlgmr.msra.gmra.mxu0 %v1307_v45 }
 0x603   : > { %v1397_v0 = vpop.f32.mrf.mxu0 }
 0x604   : > { %v1398_v47 = vadd.f32 %v1629_v46, %v1397_v0 }
 0x605   : > { %v1943_v48 = vpop.f32.mrf.mxu0 }
 0x606   : > { %1401 = vst.msk [vmem:[%s702_s29] sm:$0xff] %vm713_vm1, %v1398_v47 }
 0x607 PF: > { %s33_s27 = sadd.s32 1, %s2235_s27  }
 0x608   : > { %p30_p2 = scmp.ge.s32.totalorder %s33_s27, 4  }
 0x60a   :  { %32 = sbr.rel (!%p30_p2) target bundleno = 10 (0xa), region = 170 }
 0x60f   :  { %1451 = vsyncpa [#allocation5], 1 }
 0x610   :  { %1453 = vsyncpa [#allocation5 + $0x1], 1 }
 0x611   :  { %1454 = vsyncpa [#allocation7], 1 }
 0x612   :  { %1455 = vsyncpa [#allocation10], 1 }
 0x613   :  { %1456 = vsyncpa [#allocation13], 1 }

</bundles_post_ra>
